<compile_context>
chip_gen: v7x
topology: tpu7x:2x2x1
jax: 0.10.0
libtpu: 0.0.40
codegen_flags: <defaults>
</compile_context>

<pallas_src>
import functools

import jax
import jax.numpy as jnp
from jax.experimental import pallas as pl
from jax.experimental.pallas import tpu as pltpu

# ---- static layout of the packed parameter slab (rows x 128 lanes, f32) ----
LANE = 128       # lane width; also padded width of fc1/fc2/fc3 outputs
IN_PAD = 8       # input features 4 -> 8 (sublane-aligned contraction dim)
OFF_W1 = 0                       # rows [0,   8):  w1 [4,32]  zero-padded to [8,128]
OFF_W2 = OFF_W1 + IN_PAD         # rows [8, 136):  w2 [32,H]  zero-padded to [128,128]
OFF_W3 = OFF_W2 + LANE           # rows [136,264): w3 [H,A]   zero-padded to [128,128]
OFF_B = OFF_W3 + LANE            # rows [264,272): b1 / b2 / b3 in rows +0,+1,+2
SLAB_ROWS = OFF_B + 8            # 272


def _round_up(n, m):
    return ((n + m - 1) // m) * m


def _net_kernel(x_ref, p_ref, o_ref):
    # x: [tb, 8] (features 4..7 are zero).  All weight sections are zero-padded
    # so every matmul is a full-width lane-dense MXU pass and padded output
    # lanes remain exactly zero.
    x = x_ref[...]
    w1 = p_ref[OFF_W1:OFF_W1 + IN_PAD, :]      # [8,   128]
    w2 = p_ref[OFF_W2:OFF_W2 + LANE, :]        # [128, 128]
    w3 = p_ref[OFF_W3:OFF_W3 + LANE, :]        # [128, 128]
    b1 = p_ref[OFF_B + 0:OFF_B + 1, :]         # [1, 128]
    b2 = p_ref[OFF_B + 1:OFF_B + 2, :]
    b3 = p_ref[OFF_B + 2:OFF_B + 3, :]

    h1 = jnp.maximum(jnp.dot(x, w1, preferred_element_type=jnp.float32) + b1, 0.0)
    h2 = jnp.maximum(jnp.dot(h1, w2, preferred_element_type=jnp.float32) + b2, 0.0)
    q = jnp.dot(h2, w3, preferred_element_type=jnp.float32) + b3
    o_ref[...] = q.astype(o_ref.dtype)


def pack_params(params):
    """Pack w1,b1,w2,b2,w3,b3 into one zero-padded [272, 128] f32 slab (do once)."""
    w1, b1 = params["w1"], params["b1"]   # [4,32],  [1,32]
    w2, b2 = params["w2"], params["b2"]   # [32,H],  [1,H]
    w3, b3 = params["w3"], params["b3"]   # [H,A],   [1,A]
    in_dim, n1 = w1.shape
    _, hidden = w2.shape
    _, actions = w3.shape
    assert in_dim <= IN_PAD and n1 <= LANE and hidden <= LANE and actions <= LANE

    slab = jnp.zeros((SLAB_ROWS, LANE), jnp.float32)
    slab = slab.at[OFF_W1:OFF_W1 + in_dim, :n1].set(w1.astype(jnp.float32))
    slab = slab.at[OFF_W2:OFF_W2 + n1, :hidden].set(w2.astype(jnp.float32))
    slab = slab.at[OFF_W3:OFF_W3 + hidden, :actions].set(w3.astype(jnp.float32))
    slab = slab.at[OFF_B + 0, :n1].set(b1.reshape(-1).astype(jnp.float32))
    slab = slab.at[OFF_B + 1, :hidden].set(b2.reshape(-1).astype(jnp.float32))
    slab = slab.at[OFF_B + 2, :actions].set(b3.reshape(-1).astype(jnp.float32))
    return slab


@functools.partial(jax.jit, static_argnames=("num_actions", "batch_tile"))
def net_forward(states, packed, *, num_actions, batch_tile=256):
    """Forward pass: states [B, 4] f32, packed [272,128] slab -> q_values [B, A]."""
    B, in_dim = states.shape
    # Batch tile: full (sublane-padded) batch for tiny B, else a bounded tile
    # so VMEM stays small and the batch grid axis can shard across cores.
    tb = batch_tile if B >= batch_tile else _round_up(B, 8)
    B_pad = _round_up(B, tb)

    # Pad features 4 -> 8 and batch to the tile multiple (zero fill).
    x = jnp.zeros((B_pad, IN_PAD), jnp.float32)
    x = x.at[:B, :in_dim].set(states.astype(jnp.float32))

    grid = (B_pad // tb,)
    flops = 2 * B_pad * (IN_PAD * LANE + LANE * LANE + LANE * LANE)
    bytes_accessed = 4 * (B_pad * IN_PAD + SLAB_ROWS * LANE + B_pad * LANE)

    out = pl.pallas_call(
        _net_kernel,
        out_shape=jax.ShapeDtypeStruct((B_pad, LANE), jnp.float32),
        grid_spec=pltpu.PrefetchScalarGridSpec(
            num_scalar_prefetch=0,
            grid=grid,
            in_specs=[
                pl.BlockSpec((tb, IN_PAD), lambda i: (i, 0)),        # activations
                pl.BlockSpec((SLAB_ROWS, LANE), lambda i: (0, 0)),   # params, resident
            ],
            out_specs=pl.BlockSpec((tb, LANE), lambda i: (i, 0)),    # lane-dense output
        ),
        compiler_params=pltpu.CompilerParams(
            dimension_semantics=("parallel",),   # shards batch tiles across TCs on v7x
        ),
        cost_estimate=pl.CostEstimate(
            flops=flops, transcendentals=0, bytes_accessed=bytes_accessed),
    )(x, packed)

    return out[:B, :num_actions]


def init_params(key, num_actions=2, hidden_layer_size=50, input_state=4):
    """PyTorch nn.Linear-style init: U[-1/sqrt(fan_in), 1/sqrt(fan_in)]."""
    ks = jax.random.split(key, 6)

    def linear(kw, kb, fan_in, fan_out):
        bound = 1.0 / jnp.sqrt(fan_in)
        w = jax.random.uniform(kw, (fan_in, fan_out), jnp.float32, -bound, bound)
        b = jax.random.uniform(kb, (1, fan_out), jnp.float32, -bound, bound)
        return w, b

    w1, b1 = linear(ks[0], ks[1], input_state, 32)
    w2, b2 = linear(ks[2], ks[3], 32, hidden_layer_size)
    w3, b3 = linear(ks[4], ks[5], hidden_layer_size, num_actions)
    return {"w1": w1, "b1": b1, "w2": w2, "b2": b2, "w3": w3, "b3": b3}


def net_forward_ref(states, p):
    h1 = jnp.maximum(states @ p["w1"] + p["b1"], 0.0)
    h2 = jnp.maximum(h1 @ p["w2"] + p["b2"], 0.0)
    return h2 @ p["w3"] + p["b3"]


if __name__ == "__main__":
    key = jax.random.PRNGKey(0)
    k_param, k_x1, k_x2 = jax.random.split(key, 3)

    num_actions = 2          # e.g. CartPole action space
    hidden_layer_size = 50

    params = init_params(k_param, num_actions=num_actions,
                         hidden_layer_size=hidden_layer_size)
    packed = pack_params(params)   # packed ONCE, reused across calls

    # Small per-env-step batch (B=2): single padded tile, lane-dense store.
    states = jax.random.normal(k_x1, (2, 4), jnp.float32)
    q = jax.block_until_ready(net_forward(states, packed, num_actions=num_actions))
    q_ref = net_forward_ref(states, params)
    assert q.shape == (2, num_actions)
    assert jnp.allclose(q, q_ref, atol=1e-5, rtol=1e-5)

    # Replay-batch sized call exercising the batch grid (3 tiles + tail padding).
    states_big = jax.random.normal(k_x2, (300, 4), jnp.float32)
    q_big = jax.block_until_ready(
        net_forward(states_big, packed, num_actions=num_actions, batch_tile=128))
    q_big_ref = net_forward_ref(states_big, params)
    assert q_big.shape == (300, num_actions)
    assert jnp.allclose(q_big, q_big_ref, atol=1e-4, rtol=1e-4)

    # TODO(synk): optional fused argmax output for per-env-step action selection
    # (kept as plain q_values to match Net.forward semantics).

    print("KERNEL_OK")
</pallas_src>

<mosaic_0001>
module attributes {stable_mosaic.version = 11 : i64} {
  func.func @_net_kernel(%arg0: i32, %arg1: memref<8x8xf32, #tpu.memory_space<vmem>>, %arg2: memref<272x128xf32, #tpu.memory_space<vmem>>, %arg3: memref<8x128xf32, #tpu.memory_space<vmem>>) attributes {dimension_semantics = [#tpu.dimension_semantics<parallel>], iteration_bounds = array<i64: 1>, scalar_prefetch = 0 : i64, scratch_operands = 0 : i64, tpu.core_type = #tpu.core_type<tc>, window_params = [{transform_indices = @transform_0, window_bounds = array<i64: 8, 8>}, {pipeline_mode = #tpu.pipeline_mode<synchronous>, transform_indices = @transform_1, window_bounds = array<i64: 272, 128>}, {transform_indices = @transform_2, window_bounds = array<i64: 8, 128>}]} {
    %c0 = arith.constant 0 : index
    %c0_0 = arith.constant 0 : index
    %0 = vector.load %arg1[%c0, %c0_0] : memref<8x8xf32, #tpu.memory_space<vmem>>, vector<8x8xf32>
    %c0_1 = arith.constant 0 : index
    %c0_2 = arith.constant 0 : index
    %1 = vector.load %arg2[%c0_1, %c0_2] : memref<272x128xf32, #tpu.memory_space<vmem>>, vector<8x128xf32>
    %c8 = arith.constant 8 : index
    %c0_3 = arith.constant 0 : index
    %2 = vector.load %arg2[%c8, %c0_3] : memref<272x128xf32, #tpu.memory_space<vmem>>, vector<128x128xf32>
    %c136 = arith.constant 136 : index
    %c0_4 = arith.constant 0 : index
    %3 = vector.load %arg2[%c136, %c0_4] : memref<272x128xf32, #tpu.memory_space<vmem>>, vector<128x128xf32>
    %c264 = arith.constant 264 : index
    %c0_5 = arith.constant 0 : index
    %4 = vector.load %arg2[%c264, %c0_5] : memref<272x128xf32, #tpu.memory_space<vmem>>, vector<1x128xf32>
    %c265 = arith.constant 265 : index
    %c0_6 = arith.constant 0 : index
    %5 = vector.load %arg2[%c265, %c0_6] : memref<272x128xf32, #tpu.memory_space<vmem>>, vector<1x128xf32>
    %c266 = arith.constant 266 : index
    %c0_7 = arith.constant 0 : index
    %6 = vector.load %arg2[%c266, %c0_7] : memref<272x128xf32, #tpu.memory_space<vmem>>, vector<1x128xf32>
    %cst = arith.constant dense<0.000000e+00> : vector<8x128xf32>
    %7 = tpu.matmul %0, %1, %cst {dimension_numbers = #tpu.dot_dimension_numbers<[1], [0], [0], [1], [0, 0, 1, 1], [], []>} : vector<8x8xf32>, vector<8x128xf32>, vector<8x128xf32> -> vector<8x128xf32>
    %8 = vector.broadcast %4 : vector<1x128xf32> to vector<8x128xf32>
    %9 = arith.addf %7, %8 : vector<8x128xf32>
    %cst_8 = arith.constant 0.000000e+00 : f32
    %10 = vector.broadcast %cst_8 : f32 to vector<8x128xf32>
    %11 = arith.maximumf %9, %10 : vector<8x128xf32>
    %cst_9 = arith.constant dense<0.000000e+00> : vector<8x128xf32>
    %12 = tpu.matmul %11, %2, %cst_9 {dimension_numbers = #tpu.dot_dimension_numbers<[1], [0], [0], [1], [0, 0, 1, 1], [], []>} : vector<8x128xf32>, vector<128x128xf32>, vector<8x128xf32> -> vector<8x128xf32>
    %13 = vector.broadcast %5 : vector<1x128xf32> to vector<8x128xf32>
    %14 = arith.addf %12, %13 : vector<8x128xf32>
    %cst_10 = arith.constant 0.000000e+00 : f32
    %15 = vector.broadcast %cst_10 : f32 to vector<8x128xf32>
    %16 = arith.maximumf %14, %15 : vector<8x128xf32>
    %cst_11 = arith.constant dense<0.000000e+00> : vector<8x128xf32>
    %17 = tpu.matmul %16, %3, %cst_11 {dimension_numbers = #tpu.dot_dimension_numbers<[1], [0], [0], [1], [0, 0, 1, 1], [], []>} : vector<8x128xf32>, vector<128x128xf32>, vector<8x128xf32> -> vector<8x128xf32>
    %18 = vector.broadcast %6 : vector<1x128xf32> to vector<8x128xf32>
    %19 = arith.addf %17, %18 : vector<8x128xf32>
    %c0_12 = arith.constant 0 : index
    %c0_13 = arith.constant 0 : index
    %20 = vector.load %arg3[%c0_12, %c0_13] : memref<8x128xf32, #tpu.memory_space<vmem>>, vector<8x128xf32>
    tpu.vector_store %arg3[%c0_12, %c0_13], %19 {strides = array<i32>} : memref<8x128xf32, #tpu.memory_space<vmem>>, vector<8x128xf32>,
    return
  }
  func.func @transform_0(%arg0: i32) -> (i32, i32) {
    %c0_i32 = arith.constant 0 : i32
    %c0_i32_0 = arith.constant 0 : i32
    return %arg0, %c0_i32 : i32, i32
  }
  func.func @transform_1(%arg0: i32) -> (i32, i32) {
    %c0_i32 = arith.constant 0 : i32
    %c0_i32_0 = arith.constant 0 : i32
    %c0_i32_1 = arith.constant 0 : i32
    return %c0_i32, %c0_i32_0 : i32, i32
  }
  func.func @transform_2(%arg0: i32) -> (i32, i32) {
    %c0_i32 = arith.constant 0 : i32
    %c0_i32_0 = arith.constant 0 : i32
    return %arg0, %c0_i32 : i32, i32
  }
}

</mosaic_0001>

<bundles_post_ra>
// kernel: net_forward.1
= control target key start
LH: loop header
LB: loop body
LE: loop exit
PB: predicated region body
PF: predicated region fallthrough
CT: control target
= control target key end

     0   :  { %7 = vsyncpa [#allocation3], 0  ;;  %s489_s9 = smov [#allocation2]   ;;  %s547_s0 = inlined_call_operand.vmem [shape: f32[8,8], index: 0, kind: input, shape index: {}]   ;;  %s548_s1 = inlined_call_operand.hbm [shape: f32[272,128], index: 1, kind: input, shape index: {}]   ;;  %s549_s2 = inlined_call_operand.vmem [shape: f32[8,128], index: 2, kind: output, shape index: {}]  }
   0x1   :  { %s15_s10 = sshll.u32 %s489_s9, 4  ;;  %s465_s13 = scalar_lea.hbm %s548_s1, 4352  ;;  %s16_s10 = int_to_ptr.vmem [resolvable:$true] %s15_s10 }
   0x2   :  { %p466_p0 = scmp.ne.s32.totalorder %s548_s1, %s465_s13  ;;  %p469_p1 = scmp.lt.u32.totalorder %s465_s13, %s548_s1 }
   0x4   :  { %p471_p2 = pnand %p469_p1, %p466_p0 }
   0x6   :  { %474 = shalt.err (!%p471_p2)
}
   0x7   :  { %s475_s18 = scalar_lea.vmem %s16_s10, 4352  ;;  %p480_p4 = scmp.lt.s32.totalorder %s16_s10, %s16_s10 }
   0x8   :  { %p476_p3 = scmp.ne.s32.totalorder %s16_s10, %s475_s18  ;;  %p481_p5 = scmp.lt.s32.totalorder %s475_s18, %s475_s18 }
   0xa   :  { %p482_p6 = por %p481_p5, %p480_p4 }
   0xc   :  { %p483_p7 = pnand %p482_p6, %p476_p3 }
   0xe   :  { %486 = shalt.err (!%p483_p7)
}
   0xf   :  { %s490_s19 = smov 128   ;;  %s491_s20 = smov 8  }
  0x10   :  { %21 = dma.hbm_to_vmem [thread:$0]  %s548_s1, 4352, %s16_s10, [#allocation3], %s490_s19, %s490_s19, %s491_s20  }
  0x11   :  { %487 = dma.done.wait [#allocation3], 4352  }
  0x12   :  { %488 = vsyncadd [#allocation3], 4294962944  ;;  %v492_v0 = vmov 0.0   ;;  %vm493_vm0 = vmmov 0   ;;  %v494_v1 = vmov 0.0|0.0   ;;  %vm66_vm1 = vcmask 64512  }
  0x13   :  { %336 = vmatprep.subr.mxu0 %v492_v0  ;;  %338 = vmatprep.mubr.msk.f32.mxu0 %vm493_vm0, %v492_v0  ;;  %v26_v2 = vld [vmem:[#allocation2] sm:$0xff]  ;;  %v27_v4 = vld [vmem:[#allocation2 + $0x8] sm:$0xff]  ;;  %v28_v5 = vld [vmem:[#allocation2 + $0x10] sm:$0xff] }
  0x14   :  { %411 = vmatprep.subr.bf16.mxu1 %v494_v1  ;;  %373 = vmatprep.mubr.msk.f32.mxu1 %vm493_vm0, %v492_v0  ;;  %v25_v3 = vld [vmem:[%s547_s0] sm:$0xff]  ;;  %v29_v6 = vld [vmem:[#allocation2 + $0x18] sm:$0xff]  ;;  %v412_v8 = vpack.c.bf16 %v28_v5, %v27_v4  ;;  %v31_v10 = vld [vmem:[#allocation2 + $0x28] sm:$0xff] }
  0x15   :  { %337 = vmatpush3.msra.mxu0 %v26_v2  ;;  %v30_v7 = vld [vmem:[#allocation2 + $0x20] sm:$0xff]  ;;  %v32_v11 = vld [vmem:[#allocation2 + $0x30] sm:$0xff]  ;;  %v33_v13 = vld [vmem:[#allocation2 + $0x38] sm:$0xff] }
  0x16   :  { %339 = vmatmul.mubr.msk.f32.vlgmr.msra.gmra.mrb[0].mxu0 %vm66_vm1, %v25_v3  ;;  %435 = vmatprep.subr.bf16.mxu0 %v494_v1  ;;  %v415_v9 = vpack.c.bf16 %v30_v7, %v29_v6  ;;  %v418_v12 = vpack.c.bf16 %v32_v11, %v31_v10  ;;  %v34_v14 = vld [vmem:[#allocation2 + $0x40] sm:$0xff]  ;;  %v35_v16 = vld [vmem:[#allocation2 + $0x48] sm:$0xff]  ;;  %v36_v17 = vld [vmem:[#allocation2 + $0x50] sm:$0xff] }
  0x17   :  { %408 = vmatprep.mubr.msk.f32.mxu0 %vm493_vm0, %v492_v0  ;;  %413 = vmatpush3.bf16.msra.mxu1 %v412_v8  ;;  %v421_v15 = vpack.c.bf16 %v34_v14, %v33_v13  ;;  %v424_v18 = vpack.c.bf16 %v36_v17, %v35_v16  ;;  %v37_v19 = vld [vmem:[#allocation2 + $0x58] sm:$0xff]  ;;  %v38_v20 = vld [vmem:[#allocation2 + $0x60] sm:$0xff]  ;;  %v39_v22 = vld [vmem:[#allocation2 + $0x68] sm:$0xff] }
  0x18   :  { %414 = vmatprep.subr.bf16.mxu1 %v494_v1  ;;  %v427_v21 = vpack.c.bf16 %v38_v20, %v37_v19  ;;  %v40_v23 = vld [vmem:[#allocation2 + $0x70] sm:$0xff]  ;;  %v41_v25 = vld [vmem:[#allocation2 + $0x78] sm:$0xff]  ;;  %v42_v26 = vld [vmem:[#allocation2 + $0x80] sm:$0xff] }
  0x19   :  { %v430_v24 = vpack.c.bf16 %v40_v23, %v39_v22  ;;  %v433_v27 = vpack.c.bf16 %v42_v26, %v41_v25  ;;  %v43_v28 = vld [vmem:[#allocation2 + $0x88] sm:$0xff]  ;;  %v44_v29 = vld [vmem:[#allocation2 + $0x90] sm:$0xff]  ;;  %v45_v30 = vld [vmem:[#allocation2 + $0x98] sm:$0xff] }
  0x1a   :  { %v436_v31 = vpack.c.bf16 %v44_v29, %v43_v28  ;;  %v46_v32 = vld [vmem:[#allocation2 + $0xa0] sm:$0xff]  ;;  %v47_v34 = vld [vmem:[#allocation2 + $0xa8] sm:$0xff]  ;;  %v48_v35 = vld [vmem:[#allocation2 + $0xb0] sm:$0xff] }
  0x1b   :  { %416 = vmatpush3.bf16.msra.mxu1 %v415_v9  ;;  %v439_v33 = vpack.c.bf16 %v46_v32, %v45_v30  ;;  %v442_v36 = vpack.c.bf16 %v48_v35, %v47_v34  ;;  %v49_v37 = vld [vmem:[#allocation2 + $0xb8] sm:$0xff]  ;;  %v50_v38 = vld [vmem:[#allocation2 + $0xc0] sm:$0xff]  ;;  %v51_v40 = vld [vmem:[#allocation2 + $0xc8] sm:$0xff] }
  0x1c   :  { %417 = vmatprep.subr.bf16.mxu1 %v494_v1  ;;  %437 = vmatpush3.bf16.msra.mxu0 %v436_v31  ;;  %v445_v39 = vpack.c.bf16 %v50_v38, %v49_v37  ;;  %v52_v41 = vld [vmem:[#allocation2 + $0xd0] sm:$0xff]  ;;  %v53_v43 = vld [vmem:[#allocation2 + $0xd8] sm:$0xff]  ;;  %v54_v44 = vld [vmem:[#allocation2 + $0xe0] sm:$0xff] }
  0x1d   :  { %438 = vmatprep.subr.bf16.mxu0 %v494_v1  ;;  %v448_v42 = vpack.c.bf16 %v52_v41, %v51_v40  ;;  %v451_v45 = vpack.c.bf16 %v54_v44, %v53_v43  ;;  %v55_v46 = vld [vmem:[#allocation2 + $0xe8] sm:$0xff]  ;;  %v56_v47 = vld [vmem:[#allocation2 + $0xf0] sm:$0xff]  ;;  %v57_v54 = vld [vmem:[#allocation2 + $0xf8] sm:$0xff] }
  0x1e   :  { %v454_v48 = vpack.c.bf16 %v56_v47, %v55_v46  ;;  %v296_v49 = vld [vmem:[#allocation2 + $0x108] ss:$0 sm:$0xff]  ;;  %v58_v55 = vld [vmem:[#allocation2 + $0x100] sm:$0xff]  ;;  %v298_v57 = vld [vmem:[#allocation2 + $0x109] ss:$0 sm:$0xff] }
  0x1f   :  { %419 = vmatpush3.bf16.msra.mxu1 %v418_v12  ;;  %v457_v56 = vpack.c.bf16 %v58_v55, %v57_v54  ;;  %v299_v62 = vld [vmem:[#allocation2 + $0x10a] ss:$0 sm:$0xff] }
  0x20   :  { %420 = vmatprep.subr.bf16.mxu1 %v494_v1  ;;  %440 = vmatpush3.bf16.msra.mxu0 %v439_v33 }
  0x21   :  { %441 = vmatprep.subr.bf16.mxu0 %v494_v1 }
  0x23   :  { %422 = vmatpush3.bf16.msra.mxu1 %v421_v15 }
  0x24   :  { %423 = vmatprep.subr.bf16.mxu1 %v494_v1  ;;  %443 = vmatpush3.bf16.msra.mxu0 %v442_v36 }
  0x25   :  { %444 = vmatprep.subr.bf16.mxu0 %v494_v1 }
  0x27   :  { %425 = vmatpush3.bf16.msra.mxu1 %v424_v18 }
  0x28   :  { %426 = vmatprep.subr.bf16.mxu1 %v494_v1  ;;  %446 = vmatpush3.bf16.msra.mxu0 %v445_v39 }
  0x29   :  { %447 = vmatprep.subr.bf16.mxu0 %v494_v1 }
  0x2b   :  { %428 = vmatpush3.bf16.msra.mxu1 %v427_v21 }
  0x2c   :  { %429 = vmatprep.subr.bf16.mxu1 %v494_v1  ;;  %449 = vmatpush3.bf16.msra.mxu0 %v448_v42 }
  0x2d   :  { %450 = vmatprep.subr.bf16.mxu0 %v494_v1 }
  0x2f   :  { %431 = vmatpush3.bf16.msra.mxu1 %v430_v24 }
  0x30   :  { %432 = vmatprep.subr.bf16.mxu1 %v494_v1  ;;  %452 = vmatpush3.bf16.msra.mxu0 %v451_v45 }
  0x31   :  { %453 = vmatprep.subr.bf16.mxu0 %v494_v1 }
  0x33   :  { %434 = vmatpush3.bf16.msra.mxu1 %v433_v27 }
  0x34   :  { %455 = vmatpush3.bf16.msra.mxu0 %v454_v48 }
  0x35   :  { %456 = vmatprep.subr.bf16.mxu0 %v494_v1 }
  0x38   :  { %458 = vmatpush3.bf16.msra.mxu0 %v457_v56 }
  0xe9   :  { %v136_v50 = vpop.f32.mrb[0].mxu0 }
  0xea   :  { %v137_v51 = vadd.f32 %v296_v49, %v136_v50  ;;  %v340_v52 = vpop.f32.mrb[1].mxu0 }
  0xec   :  { %v140_v53 = vmax.f32 %v137_v51, 0.0 }
  0xee   :  { %374 = vmatmul.mubr.f32.vlgmr.msra.gmra.mrb[0].mxu1 %v140_v53 }
 0x1c1   :  { %v211_v58 = vpop.f32.mrb[0].mxu1 }
 0x1c2   :  { %v212_v59 = vadd.f32 %v298_v57, %v211_v58  ;;  %v375_v60 = vpop.f32.mrb[1].mxu1 }
 0x1c4   :  { %v215_v61 = vmax.f32 %v212_v59, 0.0 }
 0x1c6   :  { %409 = vmatmul.mubr.f32.vlgmr.msra.gmra.mrb[2].mxu0 %v215_v61 }
 0x299   :  { %v286_v63 = vpop.f32.mrb[2].mxu0 }
 0x29a   :  { %v287_v0 = vadd.f32 %v299_v62, %v286_v63  ;;  %v410_v1 = vpop.f32.mrb[3].mxu0 }
 0x29c   :  { %290 = vst [vmem:[%s549_s2] sm:$0xff] %v287_v0 }
 0x29d   :  { %295 = vsyncpa [#allocation3], 1 }

</bundles_post_ra>
